<compile_context>
chip_gen: v6e
topology: v6e:2x2x1
jax: 0.10.0
libtpu: 0.0.40
codegen_flags: <defaults>
</compile_context>

<pallas_src>
import jax
import jax.numpy as jnp
from jax.experimental import pallas as pl
from jax.experimental.pallas import tpu as pltpu

_LANE = 128
_MIN_TB = 16  # bf16 sublane packing: 16 rows per packed (16,128) bf16 tile


def _round_up(x, m):
    return ((x + m - 1) // m) * m


def _cdiv(a, b):
    return -(-a // b)


def _make_mlp_kernel(num_layers):
    """Fused MLP kernel. Ref order: x, (W1, b1), ..., (W_L, b_L), out.

    W_i: bf16 [in_p, out_p] (transposed vs nn.Linear), b_i: f32 [1, out_p].
    Last layer has no activation (output layer).
    """

    def kernel(*refs):
        x_ref = refs[0]
        out_ref = refs[-1]
        param_refs = refs[1:-1]

        h = x_ref[...]  # bf16 [TB, in_p]
        for i in range(num_layers):
            w = param_refs[2 * i][...]          # bf16 [fin_p, fout_p]
            b = param_refs[2 * i + 1][...]      # f32  [1, fout_p]
            acc = jnp.dot(h, w, preferred_element_type=jnp.float32) + b
            if i < num_layers - 1:
                # Hidden layer: ReLU (dropout == identity at inference); carry bf16 between layers.
                h = jnp.maximum(acc, 0.0).astype(jnp.bfloat16)
            else:
                out_ref[...] = acc.astype(out_ref.dtype)

    return kernel


def pack_params(params):
    """Pads feature dims to 128 lanes and casts weights to bf16 ONCE (outside the per-call path).

    Args:
      params: list of (W, b); W: [in_features, out_features] (transposed vs nn.Linear),
        b: [out_features]. Last tuple is the output layer.
    """
    dims = [int(params[0][0].shape[0])] + [int(w.shape[1]) for w, _ in params]
    dims_p = [_round_up(d, _LANE) for d in dims]
    flat = []
    for li, (w, b) in enumerate(params):
        fin_p, fout_p = dims_p[li], dims_p[li + 1]
        w_p = jnp.zeros((fin_p, fout_p), jnp.bfloat16)
        w_p = w_p.at[: w.shape[0], : w.shape[1]].set(w.astype(jnp.bfloat16))
        b_p = jnp.zeros((1, fout_p), jnp.float32)
        b_p = b_p.at[0, : b.shape[0]].set(b.astype(jnp.float32))
        flat.extend((w_p, b_p))
    return {"flat": tuple(flat), "dims": tuple(dims), "dims_p": tuple(dims_p)}


def _choose_tiling(batch, per_row_bytes, act_budget, max_batch_tile):
    """Picks (tb, batch_p): tile fits VMEM budget, >=2 grid tiles when possible, minimal padding."""
    batch_r = _round_up(batch, _MIN_TB)
    # Largest tile (multiple of 16) fitting the activation VMEM budget and the user cap.
    fit = (act_budget // max(per_row_bytes, 1)) // _MIN_TB * _MIN_TB
    tb_cap = max(_MIN_TB, min(max_batch_tile, batch_r, fit))
    # Keep >= 2 grid tiles when the batch allows (shards across both v7x TensorCores; ~free elsewhere).
    if batch_r >= 2 * _MIN_TB:
        tb_cap = min(tb_cap, max(_MIN_TB, (batch_r // 2) // _MIN_TB * _MIN_TB))
    # Fewest tiles given the cap, then shrink tb to minimize batch padding (no power-of-two rounding).
    n_tiles = _cdiv(batch_r, tb_cap)
    tb = _round_up(_cdiv(batch_r, n_tiles), _MIN_TB)
    batch_p = _round_up(batch_r, tb)
    return tb, batch_p


def fully_connected_dnn_forward(x, params, *, max_batch_tile=2048, out_dtype=jnp.float32):
    """Runs the fused MLP Pallas kernel.

    Args:
      x: [batch, input_size] float array.
      params: either pre-packed params from pack_params(...) (preferred: packs once), or a raw
        list of (W, b) with W: [in_features, out_features] (transposed vs nn.Linear).
    Returns:
      [batch, output_size] array of out_dtype (default float32).
    """
    packed = params if isinstance(params, dict) else pack_params(params)
    flat_params = packed["flat"]
    dims, dims_p = packed["dims"], packed["dims_p"]
    num_layers = len(dims) - 1
    in_features, output_size = dims[0], dims[-1]
    in_p, out_p = dims_p[0], dims_p[-1]

    batch = x.shape[0]
    assert x.shape[1] == in_features, (x.shape, in_features)

    weight_bytes = sum(int(p.size) * p.dtype.itemsize for p in flat_params)

    # ---- Generation-aware VMEM budget (v7x: 64 MiB; v5e/v6e: 128 MiB). ----
    try:
        vmem_capacity = int(pltpu.get_tpu_info().vmem_capacity_bytes)
    except Exception:  # pragma: no cover - conservative fallback
        vmem_capacity = 64 << 20

    act_width = max(dims_p)
    out_bytes = jnp.dtype(out_dtype).itemsize
    # Weights/biases are single-buffered (Buffered(1)); x/out tiles are double-buffered by default.
    per_row_bytes = 2 * 2 * in_p + 2 * out_bytes * out_p + 6 * act_width
    act_budget = max(vmem_capacity - weight_bytes - (8 << 20), 4 << 20)

    tb, batch_p = _choose_tiling(batch, per_row_bytes, act_budget, max_batch_tile)
    grid = (batch_p // tb,)

    # Pad + cast the activations once per call (bf16 halves activation HBM traffic).
    x_p = jnp.zeros((batch_p, in_p), jnp.bfloat16)
    x_p = x_p.at[:batch, :in_features].set(x.astype(jnp.bfloat16))

    out_spec = pl.BlockSpec((tb, out_p), lambda i: (i, 0))

    # ---- Explicit scoped-VMEM limit: 1x resident weights + 2x activation tiles + headroom. ----
    vmem_limit = (weight_bytes
                  + 2 * tb * in_p * 2
                  + 2 * tb * out_p * out_bytes
                  + tb * act_width * 6
                  + (4 << 20))
    vmem_limit = int(min(max(vmem_limit, 32 << 20), vmem_capacity))

    flops = 2 * batch_p * sum(dims_p[i] * dims_p[i + 1] for i in range(num_layers))
    bytes_accessed = int(x_p.size * 2 + weight_bytes + batch_p * out_p * out_bytes)

    kernel = _make_mlp_kernel(num_layers)

    def _run(resident_mode):
        in_specs = [pl.BlockSpec((tb, in_p), lambda i: (i, 0))]
        for li in range(num_layers):
            fin_p, fout_p = dims_p[li], dims_p[li + 1]
            in_specs.append(pl.BlockSpec((fin_p, fout_p), lambda i: (0, 0),
                                         pipeline_mode=resident_mode))  # weight: VMEM-resident
            in_specs.append(pl.BlockSpec((1, fout_p), lambda i: (0, 0),
                                         pipeline_mode=resident_mode))  # bias:   VMEM-resident
        return pl.pallas_call(
            kernel,
            out_shape=jax.ShapeDtypeStruct((batch_p, out_p), out_dtype),
            grid=grid,
            in_specs=in_specs,
            out_specs=out_spec,
            compiler_params=pltpu.CompilerParams(
                dimension_semantics=("parallel",),
                vmem_limit_bytes=vmem_limit,
            ),
            cost_estimate=pl.CostEstimate(
                flops=flops, transcendentals=0, bytes_accessed=bytes_accessed),
        )(x_p, *flat_params)

    try:
        # Single-buffer the constant-index weights/biases (halves their VMEM footprint).
        out_padded = _run(pl.Buffered(1))
    except Exception:
        # Fallback: default double-buffering (still correct, just uses 2x weight VMEM).
        out_padded = _run(None)

    return out_padded[:batch, :output_size]


def init_params(key, input_size, layer_sizes, output_size):
    """Deterministic init matching nn.Linear (weights stored transposed: [in, out])."""
    params = []
    sizes_in = [input_size] + list(layer_sizes)
    sizes_out = list(layer_sizes) + [output_size]
    for fin, fout in zip(sizes_in, sizes_out):
        key, kw, kb = jax.random.split(key, 3)
        bound = 1.0 / jnp.sqrt(jnp.float32(fin))
        w = jax.random.uniform(kw, (fin, fout), jnp.float32, -bound, bound)
        b = jax.random.uniform(kb, (fout,), jnp.float32, -bound, bound)
        params.append((w, b))
    return params


def reference_forward(x, params):
    """Pure-JAX reference with the same bf16-activation / f32-accumulate numerics as the kernel."""
    h = x.astype(jnp.bfloat16)
    for w, b in params[:-1]:
        acc = jnp.dot(h, w.astype(jnp.bfloat16),
                      preferred_element_type=jnp.float32) + jnp.reshape(b, (1, -1))
        h = jnp.maximum(acc, 0.0).astype(jnp.bfloat16)
    w_o, b_o = params[-1]
    return jnp.dot(h, w_o.astype(jnp.bfloat16),
                   preferred_element_type=jnp.float32) + jnp.reshape(b_o, (1, -1))


if __name__ == "__main__":
    input_size = 32
    layer_sizes = [64, 32]
    output_size = 16
    batch = 8

    key = jax.random.PRNGKey(0)
    key, kx = jax.random.split(key)
    x = jax.random.normal(kx, (batch, input_size), jnp.float32)

    params = init_params(key, input_size, layer_sizes, output_size)
    packed = pack_params(params)  # pad + cast weights once, outside the per-call path

    out = fully_connected_dnn_forward(x, packed)
    out = jax.block_until_ready(out)

    ref = reference_forward(x, params)
    assert out.shape == (batch, output_size), out.shape
    assert jnp.allclose(out, ref, atol=1e-3, rtol=1e-3), "mismatch vs JAX reference"

    print("KERNEL_OK")
</pallas_src>

<mosaic_0001>
module attributes {stable_mosaic.version = 11 : i64} {
  func.func @kernel(%arg0: i32, %arg1: memref<16x128xbf16, #tpu.memory_space<vmem>>, %arg2: memref<128x128xbf16, #tpu.memory_space<vmem>>, %arg3: memref<1x128xf32, #tpu.memory_space<vmem>>, %arg4: memref<128x128xbf16, #tpu.memory_space<vmem>>, %arg5: memref<1x128xf32, #tpu.memory_space<vmem>>, %arg6: memref<128x128xbf16, #tpu.memory_space<vmem>>, %arg7: memref<1x128xf32, #tpu.memory_space<vmem>>, %arg8: memref<16x128xf32, #tpu.memory_space<vmem>>) attributes {dimension_semantics = [#tpu.dimension_semantics<parallel>], iteration_bounds = array<i64: 1>, scalar_prefetch = 0 : i64, scratch_operands = 0 : i64, tpu.core_type = #tpu.core_type<tc>, window_params = [{transform_indices = @transform_0, window_bounds = array<i64: 16, 128>}, {pipeline_mode = #tpu.pipeline_mode<synchronous>, transform_indices = @transform_1, window_bounds = array<i64: 128, 128>}, {pipeline_mode = #tpu.pipeline_mode<synchronous>, transform_indices = @transform_2, window_bounds = array<i64: 1, 128>}, {pipeline_mode = #tpu.pipeline_mode<synchronous>, transform_indices = @transform_3, window_bounds = array<i64: 128, 128>}, {pipeline_mode = #tpu.pipeline_mode<synchronous>, transform_indices = @transform_4, window_bounds = array<i64: 1, 128>}, {pipeline_mode = #tpu.pipeline_mode<synchronous>, transform_indices = @transform_5, window_bounds = array<i64: 128, 128>}, {pipeline_mode = #tpu.pipeline_mode<synchronous>, transform_indices = @transform_6, window_bounds = array<i64: 1, 128>}, {transform_indices = @transform_7, window_bounds = array<i64: 16, 128>}]} {
    %c0 = arith.constant 0 : index
    %c0_0 = arith.constant 0 : index
    %0 = vector.load %arg1[%c0, %c0_0] : memref<16x128xbf16, #tpu.memory_space<vmem>>, vector<16x128xbf16>
    %c0_1 = arith.constant 0 : index
    %c0_2 = arith.constant 0 : index
    %1 = vector.load %arg2[%c0_1, %c0_2] : memref<128x128xbf16, #tpu.memory_space<vmem>>, vector<128x128xbf16>
    %c0_3 = arith.constant 0 : index
    %c0_4 = arith.constant 0 : index
    %2 = vector.load %arg3[%c0_3, %c0_4] : memref<1x128xf32, #tpu.memory_space<vmem>>, vector<1x128xf32>
    %cst = arith.constant dense<0.000000e+00> : vector<16x128xf32>
    %3 = tpu.matmul %0, %1, %cst {dimension_numbers = #tpu.dot_dimension_numbers<[1], [0], [0], [1], [0, 0, 1, 1], [], []>} : vector<16x128xbf16>, vector<128x128xbf16>, vector<16x128xf32> -> vector<16x128xf32>
    %4 = vector.broadcast %2 : vector<1x128xf32> to vector<16x128xf32>
    %5 = arith.addf %3, %4 : vector<16x128xf32>
    %cst_5 = arith.constant 0.000000e+00 : f32
    %6 = vector.broadcast %cst_5 : f32 to vector<16x128xf32>
    %7 = arith.maximumf %5, %6 : vector<16x128xf32>
    %8 = arith.truncf %7 : vector<16x128xf32> to vector<16x128xbf16>
    %c0_6 = arith.constant 0 : index
    %c0_7 = arith.constant 0 : index
    %9 = vector.load %arg4[%c0_6, %c0_7] : memref<128x128xbf16, #tpu.memory_space<vmem>>, vector<128x128xbf16>
    %c0_8 = arith.constant 0 : index
    %c0_9 = arith.constant 0 : index
    %10 = vector.load %arg5[%c0_8, %c0_9] : memref<1x128xf32, #tpu.memory_space<vmem>>, vector<1x128xf32>
    %cst_10 = arith.constant dense<0.000000e+00> : vector<16x128xf32>
    %11 = tpu.matmul %8, %9, %cst_10 {dimension_numbers = #tpu.dot_dimension_numbers<[1], [0], [0], [1], [0, 0, 1, 1], [], []>} : vector<16x128xbf16>, vector<128x128xbf16>, vector<16x128xf32> -> vector<16x128xf32>
    %12 = vector.broadcast %10 : vector<1x128xf32> to vector<16x128xf32>
    %13 = arith.addf %11, %12 : vector<16x128xf32>
    %cst_11 = arith.constant 0.000000e+00 : f32
    %14 = vector.broadcast %cst_11 : f32 to vector<16x128xf32>
    %15 = arith.maximumf %13, %14 : vector<16x128xf32>
    %16 = arith.truncf %15 : vector<16x128xf32> to vector<16x128xbf16>
    %c0_12 = arith.constant 0 : index
    %c0_13 = arith.constant 0 : index
    %17 = vector.load %arg6[%c0_12, %c0_13] : memref<128x128xbf16, #tpu.memory_space<vmem>>, vector<128x128xbf16>
    %c0_14 = arith.constant 0 : index
    %c0_15 = arith.constant 0 : index
    %18 = vector.load %arg7[%c0_14, %c0_15] : memref<1x128xf32, #tpu.memory_space<vmem>>, vector<1x128xf32>
    %cst_16 = arith.constant dense<0.000000e+00> : vector<16x128xf32>
    %19 = tpu.matmul %16, %17, %cst_16 {dimension_numbers = #tpu.dot_dimension_numbers<[1], [0], [0], [1], [0, 0, 1, 1], [], []>} : vector<16x128xbf16>, vector<128x128xbf16>, vector<16x128xf32> -> vector<16x128xf32>
    %20 = vector.broadcast %18 : vector<1x128xf32> to vector<16x128xf32>
    %21 = arith.addf %19, %20 : vector<16x128xf32>
    %c0_17 = arith.constant 0 : index
    %c0_18 = arith.constant 0 : index
    %22 = vector.load %arg8[%c0_17, %c0_18] : memref<16x128xf32, #tpu.memory_space<vmem>>, vector<16x128xf32>
    tpu.vector_store %arg8[%c0_17, %c0_18], %21 {strides = array<i32>} : memref<16x128xf32, #tpu.memory_space<vmem>>, vector<16x128xf32>,
    return
  }
  func.func @transform_0(%arg0: i32) -> (i32, i32) {
    %c0_i32 = arith.constant 0 : i32
    %c0_i32_0 = arith.constant 0 : i32
    return %arg0, %c0_i32 : i32, i32
  }
  func.func @transform_1(%arg0: i32) -> (i32, i32) {
    %c0_i32 = arith.constant 0 : i32
    %c0_i32_0 = arith.constant 0 : i32
    %c0_i32_1 = arith.constant 0 : i32
    return %c0_i32, %c0_i32_0 : i32, i32
  }
  func.func @transform_2(%arg0: i32) -> (i32, i32) {
    %c0_i32 = arith.constant 0 : i32
    %c0_i32_0 = arith.constant 0 : i32
    %c0_i32_1 = arith.constant 0 : i32
    return %c0_i32, %c0_i32_0 : i32, i32
  }
  func.func @transform_3(%arg0: i32) -> (i32, i32) {
    %c0_i32 = arith.constant 0 : i32
    %c0_i32_0 = arith.constant 0 : i32
    %c0_i32_1 = arith.constant 0 : i32
    return %c0_i32, %c0_i32_0 : i32, i32
  }
  func.func @transform_4(%arg0: i32) -> (i32, i32) {
    %c0_i32 = arith.constant 0 : i32
    %c0_i32_0 = arith.constant 0 : i32
    %c0_i32_1 = arith.constant 0 : i32
    return %c0_i32, %c0_i32_0 : i32, i32
  }
  func.func @transform_5(%arg0: i32) -> (i32, i32) {
    %c0_i32 = arith.constant 0 : i32
    %c0_i32_0 = arith.constant 0 : i32
    %c0_i32_1 = arith.constant 0 : i32
    return %c0_i32, %c0_i32_0 : i32, i32
  }
  func.func @transform_6(%arg0: i32) -> (i32, i32) {
    %c0_i32 = arith.constant 0 : i32
    %c0_i32_0 = arith.constant 0 : i32
    %c0_i32_1 = arith.constant 0 : i32
    return %c0_i32, %c0_i32_0 : i32, i32
  }
  func.func @transform_7(%arg0: i32) -> (i32, i32) {
    %c0_i32 = arith.constant 0 : i32
    %c0_i32_0 = arith.constant 0 : i32
    return %arg0, %c0_i32 : i32, i32
  }
}

module attributes {stable_mosaic.version = 11 : i64} {
  func.func @kernel(%arg0: i32, %arg1: memref<16x128xbf16, #tpu.memory_space<vmem>>, %arg2: memref<128x128xbf16, #tpu.memory_space<vmem>>, %arg3: memref<1x128xf32, #tpu.memory_space<vmem>>, %arg4: memref<128x128xbf16, #tpu.memory_space<vmem>>, %arg5: memref<1x128xf32, #tpu.memory_space<vmem>>, %arg6: memref<128x128xbf16, #tpu.memory_space<vmem>>, %arg7: memref<1x128xf32, #tpu.memory_space<vmem>>, %arg8: memref<16x128xf32, #tpu.memory_space<vmem>>) attributes {dimension_semantics = [#tpu.dimension_semantics<parallel>], iteration_bounds = array<i64: 1>, scalar_prefetch = 0 : i64, scratch_operands = 0 : i64, tpu.core_type = #tpu.core_type<tc>, window_params = [{transform_indices = @transform_0, window_bounds = array<i64: 16, 128>}, {pipeline_mode = #tpu.pipeline_mode<synchronous>, transform_indices = @transform_1, window_bounds = array<i64: 128, 128>}, {pipeline_mode = #tpu.pipeline_mode<synchronous>, transform_indices = @transform_2, window_bounds = array<i64: 1, 128>}, {pipeline_mode = #tpu.pipeline_mode<synchronous>, transform_indices = @transform_3, window_bounds = array<i64: 128, 128>}, {pipeline_mode = #tpu.pipeline_mode<synchronous>, transform_indices = @transform_4, window_bounds = array<i64: 1, 128>}, {pipeline_mode = #tpu.pipeline_mode<synchronous>, transform_indices = @transform_5, window_bounds = array<i64: 128, 128>}, {pipeline_mode = #tpu.pipeline_mode<synchronous>, transform_indices = @transform_6, window_bounds = array<i64: 1, 128>}, {transform_indices = @transform_7, window_bounds = array<i64: 16, 128>}]} {
    %c0 = arith.constant 0 : index
    %c0_0 = arith.constant 0 : index
    %0 = vector.load %arg1[%c0, %c0_0] : memref<16x128xbf16, #tpu.memory_space<vmem>>, vector<16x128xbf16>
    %c0_1 = arith.constant 0 : index
    %c0_2 = arith.constant 0 : index
    %1 = vector.load %arg2[%c0_1, %c0_2] : memref<128x128xbf16, #tpu.memory_space<vmem>>, vector<128x128xbf16>
    %c0_3 = arith.constant 0 : index
    %c0_4 = arith.constant 0 : index
    %2 = vector.load %arg3[%c0_3, %c0_4] : memref<1x128xf32, #tpu.memory_space<vmem>>, vector<1x128xf32>
    %cst = arith.constant dense<0.000000e+00> : vector<16x128xf32>
    %3 = tpu.matmul %0, %1, %cst {dimension_numbers = #tpu.dot_dimension_numbers<[1], [0], [0], [1], [0, 0, 1, 1], [], []>} : vector<16x128xbf16>, vector<128x128xbf16>, vector<16x128xf32> -> vector<16x128xf32>
    %4 = vector.broadcast %2 : vector<1x128xf32> to vector<16x128xf32>
    %5 = arith.addf %3, %4 : vector<16x128xf32>
    %cst_5 = arith.constant 0.000000e+00 : f32
    %6 = vector.broadcast %cst_5 : f32 to vector<16x128xf32>
    %7 = arith.maximumf %5, %6 : vector<16x128xf32>
    %8 = arith.truncf %7 : vector<16x128xf32> to vector<16x128xbf16>
    %c0_6 = arith.constant 0 : index
    %c0_7 = arith.constant 0 : index
    %9 = vector.load %arg4[%c0_6, %c0_7] : memref<128x128xbf16, #tpu.memory_space<vmem>>, vector<128x128xbf16>
    %c0_8 = arith.constant 0 : index
    %c0_9 = arith.constant 0 : index
    %10 = vector.load %arg5[%c0_8, %c0_9] : memref<1x128xf32, #tpu.memory_space<vmem>>, vector<1x128xf32>
    %cst_10 = arith.constant dense<0.000000e+00> : vector<16x128xf32>
    %11 = tpu.matmul %8, %9, %cst_10 {dimension_numbers = #tpu.dot_dimension_numbers<[1], [0], [0], [1], [0, 0, 1, 1], [], []>} : vector<16x128xbf16>, vector<128x128xbf16>, vector<16x128xf32> -> vector<16x128xf32>
    %12 = vector.broadcast %10 : vector<1x128xf32> to vector<16x128xf32>
    %13 = arith.addf %11, %12 : vector<16x128xf32>
    %cst_11 = arith.constant 0.000000e+00 : f32
    %14 = vector.broadcast %cst_11 : f32 to vector<16x128xf32>
    %15 = arith.maximumf %13, %14 : vector<16x128xf32>
    %16 = arith.truncf %15 : vector<16x128xf32> to vector<16x128xbf16>
    %c0_12 = arith.constant 0 : index
    %c0_13 = arith.constant 0 : index
    %17 = vector.load %arg6[%c0_12, %c0_13] : memref<128x128xbf16, #tpu.memory_space<vmem>>, vector<128x128xbf16>
    %c0_14 = arith.constant 0 : index
    %c0_15 = arith.constant 0 : index
    %18 = vector.load %arg7[%c0_14, %c0_15] : memref<1x128xf32, #tpu.memory_space<vmem>>, vector<1x128xf32>
    %cst_16 = arith.constant dense<0.000000e+00> : vector<16x128xf32>
    %19 = tpu.matmul %16, %17, %cst_16 {dimension_numbers = #tpu.dot_dimension_numbers<[1], [0], [0], [1], [0, 0, 1, 1], [], []>} : vector<16x128xbf16>, vector<128x128xbf16>, vector<16x128xf32> -> vector<16x128xf32>
    %20 = vector.broadcast %18 : vector<1x128xf32> to vector<16x128xf32>
    %21 = arith.addf %19, %20 : vector<16x128xf32>
    %c0_17 = arith.constant 0 : index
    %c0_18 = arith.constant 0 : index
    %22 = vector.load %arg8[%c0_17, %c0_18] : memref<16x128xf32, #tpu.memory_space<vmem>>, vector<16x128xf32>
    tpu.vector_store %arg8[%c0_17, %c0_18], %21 {strides = array<i32>} : memref<16x128xf32, #tpu.memory_space<vmem>>, vector<16x128xf32>,
    return
  }
  func.func @transform_0(%arg0: i32) -> (i32, i32) {
    %c0_i32 = arith.constant 0 : i32
    %c0_i32_0 = arith.constant 0 : i32
    return %arg0, %c0_i32 : i32, i32
  }
  func.func @transform_1(%arg0: i32) -> (i32, i32) {
    %c0_i32 = arith.constant 0 : i32
    %c0_i32_0 = arith.constant 0 : i32
    %c0_i32_1 = arith.constant 0 : i32
    return %c0_i32, %c0_i32_0 : i32, i32
  }
  func.func @transform_2(%arg0: i32) -> (i32, i32) {
    %c0_i32 = arith.constant 0 : i32
    %c0_i32_0 = arith.constant 0 : i32
    %c0_i32_1 = arith.constant 0 : i32
    return %c0_i32, %c0_i32_0 : i32, i32
  }
  func.func @transform_3(%arg0: i32) -> (i32, i32) {
    %c0_i32 = arith.constant 0 : i32
    %c0_i32_0 = arith.constant 0 : i32
    %c0_i32_1 = arith.constant 0 : i32
    return %c0_i32, %c0_i32_0 : i32, i32
  }
  func.func @transform_4(%arg0: i32) -> (i32, i32) {
    %c0_i32 = arith.constant 0 : i32
    %c0_i32_0 = arith.constant 0 : i32
    %c0_i32_1 = arith.constant 0 : i32
    return %c0_i32, %c0_i32_0 : i32, i32
  }
  func.func @transform_5(%arg0: i32) -> (i32, i32) {
    %c0_i32 = arith.constant 0 : i32
    %c0_i32_0 = arith.constant 0 : i32
    %c0_i32_1 = arith.constant 0 : i32
    return %c0_i32, %c0_i32_0 : i32, i32
  }
  func.func @transform_6(%arg0: i32) -> (i32, i32) {
    %c0_i32 = arith.constant 0 : i32
    %c0_i32_0 = arith.constant 0 : i32
    %c0_i32_1 = arith.constant 0 : i32
    return %c0_i32, %c0_i32_0 : i32, i32
  }
  func.func @transform_7(%arg0: i32) -> (i32, i32) {
    %c0_i32 = arith.constant 0 : i32
    %c0_i32_0 = arith.constant 0 : i32
    return %arg0, %c0_i32 : i32, i32
  }
}

</mosaic_0001>

<bundles_post_ra>
// kernel: tpu_custom_call.1
= control target key start
LH: loop header
LB: loop body
LE: loop exit
PB: predicated region body
PF: predicated region fallthrough
CT: control target
= control target key end

     0   :  { %12 = vsyncpa [#allocation3], 0  ;;  %s830_s0 = inlined_call_operand.hbm [shape: bf16[16,128], index: 0, kind: input, shape index: {}]   ;;  %s831_s1 = inlined_call_operand.hbm [shape: bf16[128,128], index: 1, kind: input, shape index: {}]   ;;  %s832_s2 = inlined_call_operand.vmem [shape: f32[1,128], index: 2, kind: input, shape index: {}]   ;;  %s833_s3 = inlined_call_operand.hbm [shape: bf16[128,128], index: 3, kind: input, shape index: {}]   ;;  %s834_s4 = inlined_call_operand.vmem [shape: f32[1,128], index: 4, kind: input, shape index: {}]   ;;  %s835_s5 = inlined_call_operand.hbm [shape: bf16[128,128], index: 5, kind: input, shape index: {}]   ;;  %s836_s6 = inlined_call_operand.vmem [shape: f32[1,128], index: 6, kind: input, shape index: {}]   ;;  %s837_s7 = inlined_call_operand.hbm [shape: f32[16,128], index: 7, kind: output, shape index: {}]  }
   0x1   :  { %13 = vsyncpa [#allocation6], 0 }
   0x2   :  { %14 = vsyncpa [#allocation9], 0 }
   0x3   :  { %15 = vsyncpa [#allocation4], 0  ;;  %s713_s24 = smov [#allocation5]   ;;  %s714_s26 = smov [#allocation2]  }
   0x4   :  { %s33_s25 = sshll.u32 %s713_s24, 4  ;;  %s21_s27 = sshll.u32 %s714_s26, 4  ;;  %s34_s25 = int_to_ptr.vmem [resolvable:$true] %s33_s25  ;;  %s22_s27 = int_to_ptr.vmem [resolvable:$true] %s21_s27 }
   0x5   :  { %s613_s28 = scalar_lea.vmem %s34_s25, 1024  ;;  %p618_p1 = scmp.lt.s32.totalorder %s34_s25, %s34_s25 }
   0x6   :  { %p614_p0 = scmp.ne.s32.totalorder %s34_s25, %s613_s28  ;;  %p619_p2 = scmp.lt.s32.totalorder %s613_s28, %s613_s28 }
   0x8   :  { %p620_p3 = por %p619_p2, %p618_p1 }
   0xa   :  { %p621_p4 = pnand %p620_p3, %p614_p0 }
   0xc   :  { %624 = shalt.err (!%p621_p4)
}
   0xd   :  { %s715_s29 = smov 64   ;;  %s716_s30 = smov 4  }
   0xe   :  { %39 = dma.hbm_to_vmem [thread:$0]  %s831_s1, 1024, %s34_s25, [#allocation6], %s715_s29, %s715_s29, %s716_s30  }
   0xf   :  { %s633_s10 = scalar_lea.vmem %s22_s27, 128  ;;  %p638_p6 = scmp.lt.s32.totalorder %s22_s27, %s22_s27 }
  0x10   :  { %p634_p5 = scmp.ne.s32.totalorder %s22_s27, %s633_s10  ;;  %p639_p7 = scmp.lt.s32.totalorder %s633_s10, %s633_s10 }
  0x12   :  { %p640_p8 = por %p639_p7, %p638_p6 }
  0x14   :  { %p641_p9 = pnand %p640_p8, %p634_p5 }
  0x16   :  { %644 = shalt.err (!%p641_p9)
}
  0x17   :  { %27 = dma.hbm_to_vmem [thread:$0]  %s830_s0, 128, %s22_s27, [#allocation3], %s715_s29, %s715_s29, %s716_s30  }
  0x18   :  { %s717_s13 = smov [#allocation7]   ;;  %s718_s15 = smov [#allocation8]  }
  0x19   :  { %s47_s14 = sshll.u32 %s717_s13, 4  ;;  %s61_s16 = sshll.u32 %s718_s15, 4  ;;  %s48_s14 = int_to_ptr.vmem [resolvable:$true] %s47_s14  ;;  %s62_s16 = int_to_ptr.vmem [resolvable:$true] %s61_s16 }
  0x1a   :  { %s653_s1 = scalar_lea.vmem %s48_s14, 1024  ;;  %p658_p11 = scmp.lt.s32.totalorder %s48_s14, %s48_s14 }
  0x1b   :  { %p654_p10 = scmp.ne.s32.totalorder %s48_s14, %s653_s1  ;;  %p659_p12 = scmp.lt.s32.totalorder %s653_s1, %s653_s1 }
  0x1d   :  { %p660_p13 = por %p659_p12, %p658_p11 }
  0x1f   :  { %p661_p0 = pnand %p660_p13, %p654_p10 }
  0x21   :  { %664 = shalt.err (!%p661_p0)
}
  0x22   :  { %53 = dma.hbm_to_vmem [thread:$0]  %s833_s3, 1024, %s48_s14, [#allocation6], %s715_s29, %s715_s29, %s716_s30  }
  0x23   :  { %s673_s0 = scalar_lea.vmem %s62_s16, 1024  ;;  %p678_p2 = scmp.lt.s32.totalorder %s62_s16, %s62_s16 }
  0x24   :  { %p674_p1 = scmp.ne.s32.totalorder %s62_s16, %s673_s0  ;;  %p679_p3 = scmp.lt.s32.totalorder %s673_s0, %s673_s0 }
  0x26   :  { %p680_p4 = por %p679_p3, %p678_p2 }
  0x28   :  { %p681_p5 = pnand %p680_p4, %p674_p1 }
  0x2a   :  { %684 = shalt.err (!%p681_p5)
}
  0x2b   :  { %67 = dma.hbm_to_vmem [thread:$0]  %s835_s5, 1024, %s62_s16, [#allocation9], %s715_s29, %s715_s29, %s716_s30  }
  0x2c   :  { %705 = dma.done.wait [#allocation3], 128  }
  0x2d   :  { %706 = vsyncadd [#allocation3], 4294967168 }
  0x2e   :  { %707 = dma.done.wait [#allocation6], 2048  }
  0x2f   :  { %708 = vsyncadd [#allocation6], 4294965248 }
  0x30   :  { %709 = dma.done.wait [#allocation9], 1024  }
  0x31   :  { %710 = vsyncadd [#allocation9], 4294966272  ;;  %v719_v0 = vmov 0.0   ;;  %vm720_vm0 = vmmov 0   ;;  %v580_v1 = vld [vmem:[#allocation5 + $0x38] sm:$0xff]   ;;  %v581_v2 = vld [vmem:[#allocation5 + $0x30] sm:$0xff]  }
  0x32   :  { %509 = vmatprep.subr.bf16.mxu0 %v719_v0  ;;  %525 = vmatprep.mubr.msk.bf16.mxu0 %vm720_vm0, %v719_v0  ;;  %v582_v3 = vld [vmem:[#allocation5 + $0x28] sm:$0xff]   ;;  %v589_v4 = vld [vmem:[#allocation7 + $0x38] sm:$0xff]   ;;  %v583_v5 = vld [vmem:[#allocation5 + $0x20] sm:$0xff]   ;;  %s721_s24 = smov [#allocation10]  }
  0x33   :  { %529 = vmatprep.subr.bf16.mxu1 %v719_v0  ;;  %545 = vmatprep.mubr.msk.bf16.mxu1 %vm720_vm0, %v719_v0  ;;  %v590_v6 = vld [vmem:[#allocation7 + $0x30] sm:$0xff]   ;;  %v584_v7 = vld [vmem:[#allocation5 + $0x18] sm:$0xff]   ;;  %v591_v8 = vld [vmem:[#allocation7 + $0x28] sm:$0xff]   ;;  %s440_s25 = sshll.u32 %s721_s24, 4  ;;  %s441_s25 = int_to_ptr.vmem [resolvable:$true] %s440_s25 }
  0x34   :  { %510 = vmatpush3.bf16.msra.mxu0 %v580_v1  ;;  %530 = vmatpush3.bf16.msra.mxu1 %v589_v4  ;;  %v585_v9 = vld [vmem:[#allocation5 + $0x10] sm:$0xff]   ;;  %v592_v10 = vld [vmem:[#allocation7 + $0x20] sm:$0xff]   ;;  %v586_v11 = vld [vmem:[#allocation5 + $0x8] sm:$0xff]   ;;  %p690_p7 = scmp.lt.s32.totalorder %s441_s25, %s441_s25 }
  0x35   :  { %511 = vmatprep.subr.bf16.mxu0 %v719_v0  ;;  %531 = vmatprep.subr.bf16.mxu1 %v719_v0  ;;  %v593_v12 = vld [vmem:[#allocation7 + $0x18] sm:$0xff]   ;;  %v587_v13 = vld [vmem:[#allocation5] sm:$0xff]   ;;  %v594_v15 = vld [vmem:[#allocation7 + $0x10] sm:$0xff]  }
  0x36   :  { %v588_v14 = vld [vmem:[#allocation2] sm:$0xff]   ;;  %v595_v16 = vld [vmem:[#allocation7 + $0x8] sm:$0xff]   ;;  %v596_v17 = vld [vmem:[#allocation7] sm:$0xff]  }
  0x37   :  { %v597_v18 = vld [vmem:[#allocation8 + $0x38] sm:$0xff]   ;;  %v598_v19 = vld [vmem:[#allocation8 + $0x30] sm:$0xff]   ;;  %v599_v20 = vld [vmem:[#allocation8 + $0x28] sm:$0xff]  }
  0x38   :  { %512 = vmatpush3.bf16.msra.mxu0 %v581_v2  ;;  %532 = vmatpush3.bf16.msra.mxu1 %v590_v6  ;;  %v600_v21 = vld [vmem:[#allocation8 + $0x20] sm:$0xff]   ;;  %v601_v22 = vld [vmem:[#allocation8 + $0x18] sm:$0xff]   ;;  %v602_v33 = vld [vmem:[#allocation8 + $0x10] sm:$0xff]  }
  0x39   :  { %513 = vmatprep.subr.bf16.mxu0 %v719_v0  ;;  %533 = vmatprep.subr.bf16.mxu1 %v719_v0  ;;  %v454_v23 = vld [vmem:[%s832_s2] ss:$0 sm:$0xff]  ;;  %v603_v34 = vld [vmem:[#allocation8 + $0x8] sm:$0xff]   ;;  %v604_v35 = vld [vmem:[#allocation8] sm:$0xff]  }
  0x3a   :  { %v464_v36 = vld [vmem:[%s834_s4] ss:$0 sm:$0xff]  ;;  %s685_s4 = scalar_lea.vmem %s441_s25, 256 }
  0x3b   :  { %v473_v46 = vld [vmem:[%s836_s6] ss:$0 sm:$0xff]  ;;  %p686_p6 = scmp.ne.s32.totalorder %s441_s25, %s685_s4  ;;  %p691_p8 = scmp.lt.s32.totalorder %s685_s4, %s685_s4 }
  0x3c   :  { %514 = vmatpush3.bf16.msra.mxu0 %v582_v3  ;;  %534 = vmatpush3.bf16.msra.mxu1 %v591_v8 }
  0x3d   :  { %515 = vmatprep.subr.bf16.mxu0 %v719_v0  ;;  %535 = vmatprep.subr.bf16.mxu1 %v719_v0  ;;  %p692_p9 = por %p691_p8, %p690_p7 }
  0x3f   :  { %p693_p10 = pnand %p692_p9, %p686_p6 }
  0x40   :  { %516 = vmatpush3.bf16.msra.mxu0 %v583_v5  ;;  %536 = vmatpush3.bf16.msra.mxu1 %v592_v10 }
  0x41   :  { %517 = vmatprep.subr.bf16.mxu0 %v719_v0  ;;  %537 = vmatprep.subr.bf16.mxu1 %v719_v0 }
  0x44   :  { %518 = vmatpush3.bf16.msra.mxu0 %v584_v7  ;;  %538 = vmatpush3.bf16.msra.mxu1 %v593_v12 }
  0x45   :  { %519 = vmatprep.subr.bf16.mxu0 %v719_v0  ;;  %539 = vmatprep.subr.bf16.mxu1 %v719_v0 }
  0x48   :  { %520 = vmatpush3.bf16.msra.mxu0 %v585_v9  ;;  %540 = vmatpush3.bf16.msra.mxu1 %v594_v15 }
  0x49   :  { %521 = vmatprep.subr.bf16.mxu0 %v719_v0  ;;  %541 = vmatprep.subr.bf16.mxu1 %v719_v0 }
  0x4c   :  { %522 = vmatpush3.bf16.msra.mxu0 %v586_v11  ;;  %542 = vmatpush3.bf16.msra.mxu1 %v595_v16 }
  0x4d   :  { %523 = vmatprep.subr.bf16.mxu0 %v719_v0  ;;  %543 = vmatprep.subr.bf16.mxu1 %v719_v0 }
  0x50   :  { %524 = vmatpush3.bf16.msra.mxu0 %v587_v13  ;;  %544 = vmatpush3.bf16.msra.mxu1 %v596_v17 }
  0x51   :  { %549 = vmatprep.subr.bf16.mxu0 %v719_v0 }
  0x53   :  { %526 = vmatmul.mubr.bf16.vlgmr.msra.gmra.mxu0 %v588_v14 }
  0x54   :  { %565 = vmatprep.mubr.msk.bf16.mxu0 %vm720_vm0, %v719_v0  ;;  %550 = vmatpush3.bf16.msra.mxu0 %v597_v18 }
  0x55   :  { %551 = vmatprep.subr.bf16.mxu0 %v719_v0 }
  0x58   :  { %552 = vmatpush3.bf16.msra.mxu0 %v598_v19 }
  0x59   :  { %553 = vmatprep.subr.bf16.mxu0 %v719_v0 }
  0x5c   :  { %554 = vmatpush3.bf16.msra.mxu0 %v599_v20 }
  0x5d   :  { %555 = vmatprep.subr.bf16.mxu0 %v719_v0 }
  0x60   :  { %556 = vmatpush3.bf16.msra.mxu0 %v600_v21 }
  0x61   :  { %557 = vmatprep.subr.bf16.mxu0 %v719_v0 }
  0x64   :  { %558 = vmatpush3.bf16.msra.mxu0 %v601_v22 }
  0x65   :  { %559 = vmatprep.subr.bf16.mxu0 %v719_v0 }
  0x68   :  { %560 = vmatpush3.bf16.msra.mxu0 %v602_v33 }
  0x69   :  { %561 = vmatprep.subr.bf16.mxu0 %v719_v0 }
  0x6c   :  { %562 = vmatpush3.bf16.msra.mxu0 %v603_v34 }
  0x6d   :  { %563 = vmatprep.subr.bf16.mxu0 %v719_v0 }
  0x70   :  { %564 = vmatpush3.bf16.msra.mxu0 %v604_v35 }
 0x113   :  { %v196_v24 = vpop.f32.mrf.mxu0 }
 0x114   :  { %v197_v26 = vadd.f32 %v454_v23, %v196_v24 }
 0x115   :  { %v527_v25 = vpop.f32.mrf.mxu0 }
 0x116   :  { %v203_v30 = vmax.f32 %v197_v26, 0.0 }
 0x117   :  { %v199_v27 = vpop.f32.mrf.mxu0 }
 0x118   :  { %v200_v28 = vadd.f32 %v454_v23, %v199_v27 }
 0x119   :  { %v528_v29 = vpop.f32.mrf.mxu0 }
 0x11a   :  { %v204_v31 = vmax.f32 %v200_v28, 0.0 }
 0x11c   :  { %v205_v32 = vpack.c.bf16 %v204_v31, %v203_v30 }
 0x11e   :  { %546 = vmatmul.mubr.bf16.vlgmr.msra.gmra.mxu1 %v205_v32 }
 0x1de   :  { %v311_v37 = vpop.f32.mrf.mxu1 }
 0x1df   :  { %v312_v39 = vadd.f32 %v464_v36, %v311_v37 }
 0x1e0   :  { %v547_v38 = vpop.f32.mrf.mxu1 }
 0x1e1   :  { %v318_v43 = vmax.f32 %v312_v39, 0.0 }
 0x1e2   :  { %v314_v40 = vpop.f32.mrf.mxu1 }
 0x1e3   :  { %v315_v41 = vadd.f32 %v464_v36, %v314_v40 }
 0x1e4   :  { %v548_v42 = vpop.f32.mrf.mxu1 }
 0x1e5   :  { %v319_v44 = vmax.f32 %v315_v41, 0.0 }
 0x1e7   :  { %v320_v45 = vpack.c.bf16 %v319_v44, %v318_v43 }
 0x1e9   :  { %566 = vmatmul.mubr.bf16.vlgmr.msra.gmra.mxu0 %v320_v45 }
 0x2a9   :  { %v426_v47 = vpop.f32.mrf.mxu0 }
 0x2aa   :  { %v427_v48 = vadd.f32 %v473_v46, %v426_v47 }
 0x2ab   :  { %v567_v49 = vpop.f32.mrf.mxu0 }
 0x2ac   :  { %433 = vst [vmem:[#allocation10] sm:$0xff] %v427_v48 }
 0x2ad   :  { %v429_v50 = vpop.f32.mrf.mxu0 }
 0x2ae   :  { %v430_v51 = vadd.f32 %v473_v46, %v429_v50 }
 0x2af   :  { %v568_v52 = vpop.f32.mrf.mxu0 }
 0x2b0   :  { %434 = vst [vmem:[#allocation10 + $0x8] sm:$0xff] %v430_v51 }
 0x2b1   :  { %696 = shalt.err (!%p693_p10)
}
 0x2b2   :  { %s722_s26 = smov 128   ;;  %s723_s6 = smov 8  }
 0x2b3   :  { %446 = dma.vmem_to_hbm [thread:$0]  %s441_s25, 256, %s837_s7, [#allocation4], %s722_s26, %s722_s26, %s723_s6  }
 0x2b4   :  { %711 = dma.done.wait [#allocation4], 256  }
 0x2b5   :  { %712 = vsyncadd [#allocation4], 4294967040 }
 0x2b6   :  { %450 = vsyncpa [#allocation3], 1 }
 0x2b7   :  { %451 = vsyncpa [#allocation6], 1 }
 0x2b8   :  { %452 = vsyncpa [#allocation9], 1 }
 0x2b9   :  { %453 = vsyncpa [#allocation4], 1 }

// kernel: tpu_custom_call.1
= control target key start
LH: loop header
LB: loop body
LE: loop exit
PB: predicated region body
PF: predicated region fallthrough
CT: control target
= control target key end

     0   :  { %12 = vsyncpa [#allocation3], 0  ;;  %s830_s0 = inlined_call_operand.hbm [shape: bf16[16,128], index: 0, kind: input, shape index: {}]   ;;  %s831_s1 = inlined_call_operand.hbm [shape: bf16[128,128], index: 1, kind: input, shape index: {}]   ;;  %s832_s2 = inlined_call_operand.vmem [shape: f32[1,128], index: 2, kind: input, shape index: {}]   ;;  %s833_s3 = inlined_call_operand.hbm [shape: bf16[128,128], index: 3, kind: input, shape index: {}]   ;;  %s834_s4 = inlined_call_operand.vmem [shape: f32[1,128], index: 4, kind: input, shape index: {}]   ;;  %s835_s5 = inlined_call_operand.hbm [shape: bf16[128,128], index: 5, kind: input, shape index: {}]   ;;  %s836_s6 = inlined_call_operand.vmem [shape: f32[1,128], index: 6, kind: input, shape index: {}]   ;;  %s837_s7 = inlined_call_operand.hbm [shape: f32[16,128], index: 7, kind: output, shape index: {}]  }
   0x1   :  { %13 = vsyncpa [#allocation6], 0 }
   0x2   :  { %14 = vsyncpa [#allocation9], 0 }
   0x3   :  { %15 = vsyncpa [#allocation4], 0  ;;  %s713_s24 = smov [#allocation5]   ;;  %s714_s26 = smov [#allocation2]  }
   0x4   :  { %s33_s25 = sshll.u32 %s713_s24, 4  ;;  %s21_s27 = sshll.u32 %s714_s26, 4  ;;  %s34_s25 = int_to_ptr.vmem [resolvable:$true] %s33_s25  ;;  %s22_s27 = int_to_ptr.vmem [resolvable:$true] %s21_s27 }
   0x5   :  { %s613_s28 = scalar_lea.vmem %s34_s25, 1024  ;;  %p618_p1 = scmp.lt.s32.totalorder %s34_s25, %s34_s25 }
   0x6   :  { %p614_p0 = scmp.ne.s32.totalorder %s34_s25, %s613_s28  ;;  %p619_p2 = scmp.lt.s32.totalorder %s613_s28, %s613_s28 }
   0x8   :  { %p620_p3 = por %p619_p2, %p618_p1 }
   0xa   :  { %p621_p4 = pnand %p620_p3, %p614_p0 }
   0xc   :  { %624 = shalt.err (!%p621_p4)
}
   0xd   :  { %s715_s29 = smov 64   ;;  %s716_s30 = smov 4  }
   0xe   :  { %39 = dma.hbm_to_vmem [thread:$0]  %s831_s1, 1024, %s34_s25, [#allocation6], %s715_s29, %s715_s29, %s716_s30  }
   0xf   :  { %s633_s10 = scalar_lea.vmem %s22_s27, 128  ;;  %p638_p6 = scmp.lt.s32.totalorder %s22_s27, %s22_s27 }
  0x10   :  { %p634_p5 = scmp.ne.s32.totalorder %s22_s27, %s633_s10  ;;  %p639_p7 = scmp.lt.s32.totalorder %s633_s10, %s633_s10 }
  0x12   :  { %p640_p8 = por %p639_p7, %p638_p6 }
  0x14   :  { %p641_p9 = pnand %p640_p8, %p634_p5 }
  0x16   :  { %644 = shalt.err (!%p641_p9)
}
  0x17   :  { %27 = dma.hbm_to_vmem [thread:$0]  %s830_s0, 128, %s22_s27, [#allocation3], %s715_s29, %s715_s29, %s716_s30  }
  0x18   :  { %s717_s13 = smov [#allocation7]   ;;  %s718_s15 = smov [#allocation8]  }
  0x19   :  { %s47_s14 = sshll.u32 %s717_s13, 4  ;;  %s61_s16 = sshll.u32 %s718_s15, 4  ;;  %s48_s14 = int_to_ptr.vmem [resolvable:$true] %s47_s14  ;;  %s62_s16 = int_to_ptr.vmem [resolvable:$true] %s61_s16 }
  0x1a   :  { %s653_s1 = scalar_lea.vmem %s48_s14, 1024  ;;  %p658_p11 = scmp.lt.s32.totalorder %s48_s14, %s48_s14 }
  0x1b   :  { %p654_p10 = scmp.ne.s32.totalorder %s48_s14, %s653_s1  ;;  %p659_p12 = scmp.lt.s32.totalorder %s653_s1, %s653_s1 }
  0x1d   :  { %p660_p13 = por %p659_p12, %p658_p11 }
  0x1f   :  { %p661_p0 = pnand %p660_p13, %p654_p10 }
  0x21   :  { %664 = shalt.err (!%p661_p0)
}
  0x22   :  { %53 = dma.hbm_to_vmem [thread:$0]  %s833_s3, 1024, %s48_s14, [#allocation6], %s715_s29, %s715_s29, %s716_s30  }
  0x23   :  { %s673_s0 = scalar_lea.vmem %s62_s16, 1024  ;;  %p678_p2 = scmp.lt.s32.totalorder %s62_s16, %s62_s16 }
  0x24   :  { %p674_p1 = scmp.ne.s32.totalorder %s62_s16, %s673_s0  ;;  %p679_p3 = scmp.lt.s32.totalorder %s673_s0, %s673_s0 }
  0x26   :  { %p680_p4 = por %p679_p3, %p678_p2 }
  0x28   :  { %p681_p5 = pnand %p680_p4, %p674_p1 }
  0x2a   :  { %684 = shalt.err (!%p681_p5)
}
  0x2b   :  { %67 = dma.hbm_to_vmem [thread:$0]  %s835_s5, 1024, %s62_s16, [#allocation9], %s715_s29, %s715_s29, %s716_s30  }
  0x2c   :  { %705 = dma.done.wait [#allocation3], 128  }
  0x2d   :  { %706 = vsyncadd [#allocation3], 4294967168 }
  0x2e   :  { %707 = dma.done.wait [#allocation6], 2048  }
  0x2f   :  { %708 = vsyncadd [#allocation6], 4294965248 }
  0x30   :  { %709 = dma.done.wait [#allocation9], 1024  }
  0x31   :  { %710 = vsyncadd [#allocation9], 4294966272  ;;  %v719_v0 = vmov 0.0   ;;  %vm720_vm0 = vmmov 0   ;;  %v580_v1 = vld [vmem:[#allocation5 + $0x38] sm:$0xff]   ;;  %v581_v2 = vld [vmem:[#allocation5 + $0x30] sm:$0xff]  }
  0x32   :  { %509 = vmatprep.subr.bf16.mxu0 %v719_v0  ;;  %525 = vmatprep.mubr.msk.bf16.mxu0 %vm720_vm0, %v719_v0  ;;  %v582_v3 = vld [vmem:[#allocation5 + $0x28] sm:$0xff]   ;;  %v589_v4 = vld [vmem:[#allocation7 + $0x38] sm:$0xff]   ;;  %v583_v5 = vld [vmem:[#allocation5 + $0x20] sm:$0xff]   ;;  %s721_s24 = smov [#allocation10]  }
  0x33   :  { %529 = vmatprep.subr.bf16.mxu1 %v719_v0  ;;  %545 = vmatprep.mubr.msk.bf16.mxu1 %vm720_vm0, %v719_v0  ;;  %v590_v6 = vld [vmem:[#allocation7 + $0x30] sm:$0xff]   ;;  %v584_v7 = vld [vmem:[#allocation5 + $0x18] sm:$0xff]   ;;  %v591_v8 = vld [vmem:[#allocation7 + $0x28] sm:$0xff]   ;;  %s440_s25 = sshll.u32 %s721_s24, 4  ;;  %s441_s25 = int_to_ptr.vmem [resolvable:$true] %s440_s25 }
  0x34   :  { %510 = vmatpush3.bf16.msra.mxu0 %v580_v1  ;;  %530 = vmatpush3.bf16.msra.mxu1 %v589_v4  ;;  %v585_v9 = vld [vmem:[#allocation5 + $0x10] sm:$0xff]   ;;  %v592_v10 = vld [vmem:[#allocation7 + $0x20] sm:$0xff]   ;;  %v586_v11 = vld [vmem:[#allocation5 + $0x8] sm:$0xff]   ;;  %p690_p7 = scmp.lt.s32.totalorder %s441_s25, %s441_s25 }
  0x35   :  { %511 = vmatprep.subr.bf16.mxu0 %v719_v0  ;;  %531 = vmatprep.subr.bf16.mxu1 %v719_v0  ;;  %v593_v12 = vld [vmem:[#allocation7 + $0x18] sm:$0xff]   ;;  %v587_v13 = vld [vmem:[#allocation5] sm:$0xff]   ;;  %v594_v15 = vld [vmem:[#allocation7 + $0x10] sm:$0xff]  }
  0x36   :  { %v588_v14 = vld [vmem:[#allocation2] sm:$0xff]   ;;  %v595_v16 = vld [vmem:[#allocation7 + $0x8] sm:$0xff]   ;;  %v596_v17 = vld [vmem:[#allocation7] sm:$0xff]  }
  0x37   :  { %v597_v18 = vld [vmem:[#allocation8 + $0x38] sm:$0xff]   ;;  %v598_v19 = vld [vmem:[#allocation8 + $0x30] sm:$0xff]   ;;  %v599_v20 = vld [vmem:[#allocation8 + $0x28] sm:$0xff]  }
  0x38   :  { %512 = vmatpush3.bf16.msra.mxu0 %v581_v2  ;;  %532 = vmatpush3.bf16.msra.mxu1 %v590_v6  ;;  %v600_v21 = vld [vmem:[#allocation8 + $0x20] sm:$0xff]   ;;  %v601_v22 = vld [vmem:[#allocation8 + $0x18] sm:$0xff]   ;;  %v602_v33 = vld [vmem:[#allocation8 + $0x10] sm:$0xff]  }
  0x39   :  { %513 = vmatprep.subr.bf16.mxu0 %v719_v0  ;;  %533 = vmatprep.subr.bf16.mxu1 %v719_v0  ;;  %v454_v23 = vld [vmem:[%s832_s2] ss:$0 sm:$0xff]  ;;  %v603_v34 = vld [vmem:[#allocation8 + $0x8] sm:$0xff]   ;;  %v604_v35 = vld [vmem:[#allocation8] sm:$0xff]  }
  0x3a   :  { %v464_v36 = vld [vmem:[%s834_s4] ss:$0 sm:$0xff]  ;;  %s685_s4 = scalar_lea.vmem %s441_s25, 256 }
  0x3b   :  { %v473_v46 = vld [vmem:[%s836_s6] ss:$0 sm:$0xff]  ;;  %p686_p6 = scmp.ne.s32.totalorder %s441_s25, %s685_s4  ;;  %p691_p8 = scmp.lt.s32.totalorder %s685_s4, %s685_s4 }
  0x3c   :  { %514 = vmatpush3.bf16.msra.mxu0 %v582_v3  ;;  %534 = vmatpush3.bf16.msra.mxu1 %v591_v8 }
  0x3d   :  { %515 = vmatprep.subr.bf16.mxu0 %v719_v0  ;;  %535 = vmatprep.subr.bf16.mxu1 %v719_v0  ;;  %p692_p9 = por %p691_p8, %p690_p7 }
  0x3f   :  { %p693_p10 = pnand %p692_p9, %p686_p6 }
  0x40   :  { %516 = vmatpush3.bf16.msra.mxu0 %v583_v5  ;;  %536 = vmatpush3.bf16.msra.mxu1 %v592_v10 }
  0x41   :  { %517 = vmatprep.subr.bf16.mxu0 %v719_v0  ;;  %537 = vmatprep.subr.bf16.mxu1 %v719_v0 }
  0x44   :  { %518 = vmatpush3.bf16.msra.mxu0 %v584_v7  ;;  %538 = vmatpush3.bf16.msra.mxu1 %v593_v12 }
  0x45   :  { %519 = vmatprep.subr.bf16.mxu0 %v719_v0  ;;  %539 = vmatprep.subr.bf16.mxu1 %v719_v0 }
  0x48   :  { %520 = vmatpush3.bf16.msra.mxu0 %v585_v9  ;;  %540 = vmatpush3.bf16.msra.mxu1 %v594_v15 }
  0x49   :  { %521 = vmatprep.subr.bf16.mxu0 %v719_v0  ;;  %541 = vmatprep.subr.bf16.mxu1 %v719_v0 }
  0x4c   :  { %522 = vmatpush3.bf16.msra.mxu0 %v586_v11  ;;  %542 = vmatpush3.bf16.msra.mxu1 %v595_v16 }
  0x4d   :  { %523 = vmatprep.subr.bf16.mxu0 %v719_v0  ;;  %543 = vmatprep.subr.bf16.mxu1 %v719_v0 }
  0x50   :  { %524 = vmatpush3.bf16.msra.mxu0 %v587_v13  ;;  %544 = vmatpush3.bf16.msra.mxu1 %v596_v17 }
  0x51   :  { %549 = vmatprep.subr.bf16.mxu0 %v719_v0 }
  0x53   :  { %526 = vmatmul.mubr.bf16.vlgmr.msra.gmra.mxu0 %v588_v14 }
  0x54   :  { %565 = vmatprep.mubr.msk.bf16.mxu0 %vm720_vm0, %v719_v0  ;;  %550 = vmatpush3.bf16.msra.mxu0 %v597_v18 }
  0x55   :  { %551 = vmatprep.subr.bf16.mxu0 %v719_v0 }
  0x58   :  { %552 = vmatpush3.bf16.msra.mxu0 %v598_v19 }
  0x59   :  { %553 = vmatprep.subr.bf16.mxu0 %v719_v0 }
  0x5c   :  { %554 = vmatpush3.bf16.msra.mxu0 %v599_v20 }
  0x5d   :  { %555 = vmatprep.subr.bf16.mxu0 %v719_v0 }
  0x60   :  { %556 = vmatpush3.bf16.msra.mxu0 %v600_v21 }
  0x61   :  { %557 = vmatprep.subr.bf16.mxu0 %v719_v0 }
  0x64   :  { %558 = vmatpush3.bf16.msra.mxu0 %v601_v22 }
  0x65   :  { %559 = vmatprep.subr.bf16.mxu0 %v719_v0 }
  0x68   :  { %560 = vmatpush3.bf16.msra.mxu0 %v602_v33 }
  0x69   :  { %561 = vmatprep.subr.bf16.mxu0 %v719_v0 }
  0x6c   :  { %562 = vmatpush3.bf16.msra.mxu0 %v603_v34 }
  0x6d   :  { %563 = vmatprep.subr.bf16.mxu0 %v719_v0 }
  0x70   :  { %564 = vmatpush3.bf16.msra.mxu0 %v604_v35 }
 0x113   :  { %v196_v24 = vpop.f32.mrf.mxu0 }
 0x114   :  { %v197_v26 = vadd.f32 %v454_v23, %v196_v24 }
 0x115   :  { %v527_v25 = vpop.f32.mrf.mxu0 }
 0x116   :  { %v203_v30 = vmax.f32 %v197_v26, 0.0 }
 0x117   :  { %v199_v27 = vpop.f32.mrf.mxu0 }
 0x118   :  { %v200_v28 = vadd.f32 %v454_v23, %v199_v27 }
 0x119   :  { %v528_v29 = vpop.f32.mrf.mxu0 }
 0x11a   :  { %v204_v31 = vmax.f32 %v200_v28, 0.0 }
 0x11c   :  { %v205_v32 = vpack.c.bf16 %v204_v31, %v203_v30 }
 0x11e   :  { %546 = vmatmul.mubr.bf16.vlgmr.msra.gmra.mxu1 %v205_v32 }
 0x1de   :  { %v311_v37 = vpop.f32.mrf.mxu1 }
 0x1df   :  { %v312_v39 = vadd.f32 %v464_v36, %v311_v37 }
 0x1e0   :  { %v547_v38 = vpop.f32.mrf.mxu1 }
 0x1e1   :  { %v318_v43 = vmax.f32 %v312_v39, 0.0 }
 0x1e2   :  { %v314_v40 = vpop.f32.mrf.mxu1 }
 0x1e3   :  { %v315_v41 = vadd.f32 %v464_v36, %v314_v40 }
 0x1e4   :  { %v548_v42 = vpop.f32.mrf.mxu1 }
 0x1e5   :  { %v319_v44 = vmax.f32 %v315_v41, 0.0 }
 0x1e7   :  { %v320_v45 = vpack.c.bf16 %v319_v44, %v318_v43 }
 0x1e9   :  { %566 = vmatmul.mubr.bf16.vlgmr.msra.gmra.mxu0 %v320_v45 }
 0x2a9   :  { %v426_v47 = vpop.f32.mrf.mxu0 }
 0x2aa   :  { %v427_v48 = vadd.f32 %v473_v46, %v426_v47 }
 0x2ab   :  { %v567_v49 = vpop.f32.mrf.mxu0 }
 0x2ac   :  { %433 = vst [vmem:[#allocation10] sm:$0xff] %v427_v48 }
 0x2ad   :  { %v429_v50 = vpop.f32.mrf.mxu0 }
 0x2ae   :  { %v430_v51 = vadd.f32 %v473_v46, %v429_v50 }
 0x2af   :  { %v568_v52 = vpop.f32.mrf.mxu0 }
 0x2b0   :  { %434 = vst [vmem:[#allocation10 + $0x8] sm:$0xff] %v430_v51 }
 0x2b1   :  { %696 = shalt.err (!%p693_p10)
}
 0x2b2   :  { %s722_s26 = smov 128   ;;  %s723_s6 = smov 8  }
 0x2b3   :  { %446 = dma.vmem_to_hbm [thread:$0]  %s441_s25, 256, %s837_s7, [#allocation4], %s722_s26, %s722_s26, %s723_s6  }
 0x2b4   :  { %711 = dma.done.wait [#allocation4], 256  }
 0x2b5   :  { %712 = vsyncadd [#allocation4], 4294967040 }
 0x2b6   :  { %450 = vsyncpa [#allocation3], 1 }
 0x2b7   :  { %451 = vsyncpa [#allocation6], 1 }
 0x2b8   :  { %452 = vsyncpa [#allocation9], 1 }
 0x2b9   :  { %453 = vsyncpa [#allocation4], 1 }

</bundles_post_ra>
